<compile_context>
chip_gen: v7x
topology: tpu7x:2x2x1
jax: 0.10.0
libtpu: 0.0.40
codegen_flags: <defaults>
</compile_context>

<pallas_src>
import numpy as np
import jax
import jax.numpy as jnp
from jax import lax
from jax.experimental import pallas as pl
from jax.experimental.pallas import tpu as pltpu

LANE = 128
SUBLANE = 8
VMEM_LIMIT_BYTES = 32 * 1024 * 1024  # >= scoped default on v5e(16MiB)/v6e(32)/v7x(32)


def _round_up(x, m):
    return ((x + m - 1) // m) * m


def _supports_buffered_one():
    try:
        pl.BlockSpec((SUBLANE, LANE), lambda i: (0, 0), pipeline_mode=pl.Buffered(1))
        return True
    except Exception:
        return False


_HAS_BUFFERED = _supports_buffered_one()


def _const_block(block_shape, index_map):
    """BlockSpec for an operand whose block never changes over the grid:
    fetched once and (when supported) single-buffered instead of being
    pointlessly double-buffered."""
    if _HAS_BUFFERED:
        return pl.BlockSpec(block_shape, index_map, pipeline_mode=pl.Buffered(1))
    return pl.BlockSpec(block_shape, index_map)


def _resident_budget_bytes():
    """Max size of the fully VMEM-resident B operand of the adjacency matmul."""
    try:
        phys = pltpu.get_tpu_info().vmem_capacity_bytes  # 64 MiB v7x, 128 MiB v5e/v6e
    except Exception:
        phys = 64 * 1024 * 1024
    budget = min(phys // 4, 16 * 1024 * 1024)
    if not _HAS_BUFFERED:          # resident operand would be double-buffered
        budget //= 2
    return budget


def _tile_rows(rows, target):
    if rows >= target:
        return target
    if rows < SUBLANE:
        return rows                 # block == full dim (allowed)
    return SUBLANE * (rows // SUBLANE)


# --------------------------------------------------------------------------
# Feature matmul:  C = A @ W (+ bias), whole weight/bias VMEM-resident.
# --------------------------------------------------------------------------
def _make_feature_kernel(has_bias, compute_dtype):
    def kernel(*refs):
        if has_bias:
            a_ref, w_ref, bias_ref, o_ref = refs
        else:
            a_ref, w_ref, o_ref = refs
            bias_ref = None
        a = a_ref[...]
        w = w_ref[...]
        if compute_dtype is not None:       # in-kernel cast (no wrapper astype pass)
            a = a.astype(compute_dtype)
            w = w.astype(compute_dtype)
        acc = jnp.dot(a, w, preferred_element_type=jnp.float32)
        if has_bias:
            acc = acc + bias_ref[...]
        o_ref[...] = acc.astype(o_ref.dtype)
    return kernel


def _feature_matmul(a, w, bias=None, *, out_dtype, compute_dtype=None, tm_target=512):
    R, K = a.shape
    Kw, Fo = w.shape
    assert K == Kw
    tm = _tile_rows(R, tm_target)
    grid = (pl.cdiv(R, tm),)

    in_specs = [pl.BlockSpec((tm, K), lambda i: (i, 0)),
                _const_block((K, Fo), lambda i: (0, 0))]
    operands = [a, w]
    if bias is not None:
        in_specs.append(_const_block((1, Fo), lambda i: (0, 0)))
        operands.append(bias)

    return pl.pallas_call(
        _make_feature_kernel(bias is not None, compute_dtype),
        out_shape=jax.ShapeDtypeStruct((R, Fo), out_dtype),
        grid_spec=pltpu.PrefetchScalarGridSpec(
            num_scalar_prefetch=0,
            grid=grid,
            in_specs=in_specs,
            out_specs=pl.BlockSpec((tm, Fo), lambda i: (i, 0)),
        ),
        compiler_params=pltpu.CompilerParams(
            dimension_semantics=("parallel",),
            vmem_limit_bytes=VMEM_LIMIT_BYTES,
        ),
    )(*operands)


# --------------------------------------------------------------------------
# Adjacency matmul:  C = adj @ B (+ bias).  adj streamed, B resident if it fits.
# --------------------------------------------------------------------------
def _make_adj_kernel(tk, rem, resident, has_bias, use_scratch, compute_dtype):
    def kernel(*refs):
        refs = list(refs)
        a_ref = refs.pop(0)
        b_ref = refs.pop(0)
        bias_ref = refs.pop(0) if has_bias else None
        o_ref = refs.pop(0)
        acc_ref = refs.pop(0) if use_scratch else o_ref   # f32 out -> accumulate in place

        k = pl.program_id(1)
        nk = pl.num_programs(1)

        @pl.when(k == 0)
        def _():
            acc_ref[...] = jnp.zeros_like(acc_ref)

        a = a_ref[...]
        if rem:
            # The last reduction block over-reads adj's columns (garbage beyond
            # col `rem`); zero them so they pair with B's exact-zero pad rows.
            col = lax.broadcasted_iota(jnp.int32, a.shape, 1)
            valid = jnp.where(k == nk - 1, rem, a.shape[1])
            a = jnp.where(col < valid, a, jnp.zeros_like(a))

        if resident:
            start = pl.multiple_of(k * tk, tk)
            b = b_ref[pl.ds(start, tk), :]
        else:
            b = b_ref[...]

        if compute_dtype is not None:        # in-kernel cast, bf16 MXU rate for free
            a = a.astype(compute_dtype)
            b = b.astype(compute_dtype)

        acc_ref[...] += jnp.dot(a, b, preferred_element_type=jnp.float32)

        if has_bias or use_scratch:
            @pl.when(k == nk - 1)
            def _():
                out = acc_ref[...]
                if has_bias:
                    out = out + bias_ref[...]
                o_ref[...] = out.astype(o_ref.dtype)

    return kernel


def _adj_matmul(adj, b, bias=None, *, tk, out_dtype, compute_dtype=None, tm_target=512):
    """C = adj[:, :Kc] @ b  (+ bias).

    adj: [N, Kc]  (Kc == N, or padded to tk only when N < 128)
    b:   [Kp, W]  with Kp = nk * tk; rows >= N are exact zeros; W lane-aligned.
    """
    R, Kc = adj.shape
    Kp, W = b.shape
    assert Kp % tk == 0 and Kc <= Kp
    nk = Kp // tk
    rem = Kc % tk                      # 0 -> no over-read of adj, no masking needed
    tm = _tile_rows(R, tm_target)
    grid = (pl.cdiv(R, tm), nk)

    resident = (nk == 1) or (Kp * W * b.dtype.itemsize <= _resident_budget_bytes())
    use_scratch = np.dtype(out_dtype) != np.dtype(np.float32)

    in_specs = [pl.BlockSpec((tm, tk), lambda i, k: (i, k))]
    operands = [adj]
    if resident:
        # Read B from HBM exactly once for the whole kernel (perf item #1).
        in_specs.append(_const_block((Kp, W), lambda i, k: (0, 0)))
    else:
        # Fallback: stream B per k-block (re-read once per row-block of adj).
        in_specs.append(pl.BlockSpec((tk, W), lambda i, k: (k, 0)))
    operands.append(b)
    if bias is not None:
        in_specs.append(_const_block((1, W), lambda i, k: (0, 0)))
        operands.append(bias)

    scratch_shapes = [pltpu.VMEM((tm, W), jnp.float32)] if use_scratch else []

    return pl.pallas_call(
        _make_adj_kernel(tk, rem, resident, bias is not None, use_scratch, compute_dtype),
        out_shape=jax.ShapeDtypeStruct((R, W), out_dtype),
        grid_spec=pltpu.PrefetchScalarGridSpec(
            num_scalar_prefetch=0,
            grid=grid,
            in_specs=in_specs,
            out_specs=pl.BlockSpec((tm, W), lambda i, k: (i, 0)),
            scratch_shapes=scratch_shapes,
        ),
        compiler_params=pltpu.CompilerParams(
            dimension_semantics=("parallel", "arbitrary"),
            vmem_limit_bytes=VMEM_LIMIT_BYTES,
        ),
    )(*operands)


# --------------------------------------------------------------------------
# GCN layer forward.
# --------------------------------------------------------------------------
def graph_convolution(x, adj, weight, bias=None, *, compute_dtype=None,
                      tm_target=512, tk_target=512):
    """out = adj @ (x @ weight) + bias   (order chosen by associativity).

    x: [N, F_in], adj: [N, N], weight: [F_in, F_out], bias: [F_out] or None.
    compute_dtype: e.g. jnp.bfloat16 -> in-kernel MXU cast + bf16 intermediate.
    """
    N, f_in = x.shape
    f_in2, f_out = weight.shape
    assert f_in == f_in2 and adj.shape == (N, N)

    inter_dtype = jnp.float32 if compute_dtype is None else compute_dtype
    fin_p = _round_up(f_in, LANE)
    fout_p = _round_up(f_out, LANE)

    # --- reduction (K = N) tiling of the adjacency matmul ---------------------
    if N < LANE:
        tk = LANE
        adj_k = jnp.pad(adj, ((0, 0), (0, tk - N)))   # cheap: only for tiny graphs
    elif N < tk_target:
        tk = LANE * (N // LANE)                        # largest 128-multiple <= N
        adj_k = adj                                    # adj is never padded at scale
    else:
        tk = tk_target
        adj_k = adj
    nk = pl.cdiv(N, tk)
    Kp = nk * tk                                       # rows of the B operand (zero-padded)

    # --- pad the cheap operands once (adj is untouched) -----------------------
    pad_rows, pad_cols = Kp - N, fin_p - f_in
    x_p = jnp.pad(x, ((0, pad_rows), (0, pad_cols))) if (pad_rows or pad_cols) else x
    if fin_p != f_in or fout_p != f_out:
        w_p = jnp.pad(weight, ((0, fin_p - f_in), (0, fout_p - f_out)))
    else:
        w_p = weight
    bias_p = None
    if bias is not None:
        bias_p = bias.reshape(1, f_out)
        if fout_p != f_out:
            bias_p = jnp.pad(bias_p, ((0, 0), (0, fout_p - f_out)))

    if f_out <= f_in:
        # adj @ (x @ W): the N^2 matmul streams over the smaller F_out lanes.
        # XW is produced already row-padded to Kp (its pad rows are exact zeros),
        # so it chains straight into the adjacency matmul with no pad/slice pass.
        xw = _feature_matmul(x_p, w_p, out_dtype=inter_dtype,
                             compute_dtype=compute_dtype, tm_target=tm_target)
        out = _adj_matmul(adj_k, xw, bias=bias_p, tk=tk, out_dtype=jnp.float32,
                          compute_dtype=compute_dtype, tm_target=tm_target)
    else:
        # (adj @ x) @ W: the N^2 matmul streams over the smaller F_in lanes.
        ax = _adj_matmul(adj_k, x_p, bias=None, tk=tk, out_dtype=inter_dtype,
                         compute_dtype=compute_dtype, tm_target=tm_target)
        out = _feature_matmul(ax, w_p, bias=bias_p, out_dtype=jnp.float32,
                              compute_dtype=compute_dtype, tm_target=tm_target)

    if fout_p != f_out:
        out = out[:, :f_out]          # only the final output is ever sliced
    return out


if __name__ == "__main__":
    key = jax.random.PRNGKey(0)
    k_x, k_adj, k_w, k_b = jax.random.split(key, 4)

    # --- small shapes consistent with the module ------------------------------
    N, F_IN, F_OUT = 8, 16, 32
    stdv = 1.0 / jnp.sqrt(jnp.float32(F_OUT))
    weight = jax.random.uniform(k_w, (F_IN, F_OUT), jnp.float32, -stdv, stdv)
    bias = jax.random.uniform(k_b, (F_OUT,), jnp.float32, -stdv, stdv)
    x = jax.random.normal(k_x, (N, F_IN), jnp.float32)
    a = jax.random.uniform(k_adj, (N, N), jnp.float32)
    adj = (a + a.T) * 0.5                         # synthetic symmetric "DAD"

    # with bias, F_in < F_out -> (adj @ x) @ W path
    out = jax.block_until_ready(graph_convolution(x, adj, weight, bias))
    ref = adj @ (x @ weight) + bias
    assert out.shape == (N, F_OUT)
    assert jnp.allclose(out, ref, atol=1e-4, rtol=1e-4), "mismatch vs reference"

    # bias=None and the other ordering (F_out <= F_in)
    w2 = jax.random.uniform(k_w, (F_OUT, F_IN), jnp.float32, -stdv, stdv)
    x2 = jax.random.normal(k_x, (N, F_OUT), jnp.float32)
    out2 = jax.block_until_ready(graph_convolution(x2, adj, w2, bias=None))
    ref2 = adj @ (x2 @ w2)
    assert jnp.allclose(out2, ref2, atol=1e-4, rtol=1e-4), "mismatch (no-bias)"

    # moderate ragged case: exercises multi-block reduction, in-kernel masking
    # of adj's last K block, resident-B slicing and partial row blocks.
    N3, F_IN3, F_OUT3 = 600, 40, 24
    k3x, k3a, k3w, k3b = jax.random.split(jax.random.PRNGKey(1), 4)
    stdv3 = 1.0 / jnp.sqrt(jnp.float32(F_OUT3))
    w3 = jax.random.uniform(k3w, (F_IN3, F_OUT3), jnp.float32, -stdv3, stdv3)
    b3 = jax.random.uniform(k3b, (F_OUT3,), jnp.float32, -stdv3, stdv3)
    x3 = jax.random.normal(k3x, (N3, F_IN3), jnp.float32)
    a3 = jax.random.uniform(k3a, (N3, N3), jnp.float32)
    adj3 = (a3 + a3.T) * (0.5 / N3)
    out3 = jax.block_until_ready(graph_convolution(x3, adj3, w3, b3))
    ref3 = adj3 @ (x3 @ w3) + b3
    assert out3.shape == (N3, F_OUT3)
    assert jnp.allclose(out3, ref3, atol=1e-4, rtol=1e-4), "mismatch (ragged)"

    print("KERNEL_OK")
</pallas_src>

<mosaic_0001>
module attributes {stable_mosaic.version = 11 : i64} {
  func.func @kernel(%arg0: i32, %arg1: i32, %arg2: memref<8x128xf32, #tpu.memory_space<vmem>>, %arg3: memref<128x128xf32, #tpu.memory_space<vmem>>, %arg4: memref<8x128xf32, #tpu.memory_space<vmem>>) attributes {dimension_semantics = [#tpu.dimension_semantics<parallel>, #tpu.dimension_semantics<arbitrary>], iteration_bounds = array<i64: 1, 1>, scalar_prefetch = 0 : i64, scratch_operands = 0 : i64, tpu.core_type = #tpu.core_type<tc>, window_params = [{transform_indices = @transform_0, window_bounds = array<i64: 8, 128>}, {pipeline_mode = #tpu.pipeline_mode<synchronous>, transform_indices = @transform_1, window_bounds = array<i64: 128, 128>}, {transform_indices = @transform_2, window_bounds = array<i64: 8, 128>}]} {
    %c0_i32 = arith.constant 0 : i32
    %0 = arith.cmpi eq, %arg1, %c0_i32 : i32
    %1 = arith.extui %0 : i1 to i32
    %c0_i32_0 = arith.constant 0 : i32
    %2 = arith.cmpi ne, %1, %c0_i32_0 : i32
    scf.if %2 {
      %cst_7 = arith.constant 0.000000e+00 : f32
      %12 = vector.broadcast %cst_7 : f32 to vector<8x128xf32>
      %c0_8 = arith.constant 0 : index
      %c0_9 = arith.constant 0 : index
      %13 = vector.load %arg4[%c0_8, %c0_9] : memref<8x128xf32, #tpu.memory_space<vmem>>, vector<8x128xf32>
      tpu.vector_store %arg4[%c0_8, %c0_9], %12 {strides = array<i32>} : memref<8x128xf32, #tpu.memory_space<vmem>>, vector<8x128xf32>,
    } else {
    }
    %c0 = arith.constant 0 : index
    %c0_1 = arith.constant 0 : index
    %3 = vector.load %arg2[%c0, %c0_1] : memref<8x128xf32, #tpu.memory_space<vmem>>, vector<8x128xf32>
    %c128_i32 = arith.constant 128 : i32
    %4 = arith.muli %arg1, %c128_i32 : i32
    %5 = tpu.assume_multiple %4, 128 : i32
    %6 = arith.index_cast %5 : i32 to index
    %c0_2 = arith.constant 0 : index
    %7 = vector.load %arg3[%6, %c0_2] : memref<128x128xf32, #tpu.memory_space<vmem>>, vector<128x128xf32>
    %c0_3 = arith.constant 0 : index
    %c0_4 = arith.constant 0 : index
    %8 = vector.load %arg4[%c0_3, %c0_4] : memref<8x128xf32, #tpu.memory_space<vmem>>, vector<8x128xf32>
    %cst = arith.constant dense<0.000000e+00> : vector<8x128xf32>
    %9 = tpu.matmul %3, %7, %cst {dimension_numbers = #tpu.dot_dimension_numbers<[1], [0], [0], [1], [0, 0, 1, 1], [], []>} : vector<8x128xf32>, vector<128x128xf32>, vector<8x128xf32> -> vector<8x128xf32>
    %10 = arith.addf %8, %9 : vector<8x128xf32>
    %c0_5 = arith.constant 0 : index
    %c0_6 = arith.constant 0 : index
    %11 = vector.load %arg4[%c0_5, %c0_6] : memref<8x128xf32, #tpu.memory_space<vmem>>, vector<8x128xf32>
    tpu.vector_store %arg4[%c0_5, %c0_6], %10 {strides = array<i32>} : memref<8x128xf32, #tpu.memory_space<vmem>>, vector<8x128xf32>,
    return
  }
  func.func @transform_0(%arg0: i32, %arg1: i32) -> (i32, i32) {
    %c0_i32 = arith.constant 0 : i32
    return %arg0, %arg1 : i32, i32
  }
  func.func @transform_1(%arg0: i32, %arg1: i32) -> (i32, i32) {
    %c0_i32 = arith.constant 0 : i32
    %c0_i32_0 = arith.constant 0 : i32
    %c0_i32_1 = arith.constant 0 : i32
    return %c0_i32, %c0_i32_0 : i32, i32
  }
  func.func @transform_2(%arg0: i32, %arg1: i32) -> (i32, i32) {
    %c0_i32 = arith.constant 0 : i32
    %c0_i32_0 = arith.constant 0 : i32
    return %arg0, %c0_i32 : i32, i32
  }
}

</mosaic_0001>

<bundles_post_ra>
// kernel: tpu_custom_call.1
= control target key start
LH: loop header
LB: loop body
LE: loop exit
PB: predicated region body
PF: predicated region fallthrough
CT: control target
= control target key end

     0   :  { %7 = vsyncpa [#allocation3], 0  ;;  %s373_s0 = inlined_call_operand.hbm [shape: f32[8,128], index: 0, kind: input, shape index: {}]   ;;  %s374_s1 = inlined_call_operand.hbm [shape: f32[128,128], index: 1, kind: input, shape index: {}]   ;;  %s375_s2 = inlined_call_operand.hbm [shape: f32[8,128], index: 2, kind: output, shape index: {}]  }
   0x1   :  { %8 = vsyncpa [#allocation6], 0 }
   0x2   :  { %9 = vsyncpa [#allocation4], 0  ;;  %s307_s9 = smov [#allocation2]   ;;  %s308_s11 = smov [#allocation5]  }
   0x3   :  { %s16_s10 = sshll.u32 %s307_s9, 4  ;;  %s25_s12 = sshll.u32 %s308_s11, 4  ;;  %s17_s10 = int_to_ptr.vmem [resolvable:$true] %s16_s10  ;;  %s330_s12 = int_to_ptr.vmem [resolvable:$true] %s25_s12 }
   0x4   :  { %s235_s15 = scalar_lea.hbm %s373_s0, 128 }
   0x5   :  { %p236_p0 = scmp.ne.s32.totalorder %s373_s0, %s235_s15  ;;  %p239_p1 = scmp.lt.u32.totalorder %s235_s15, %s373_s0 }
   0x7   :  { %p241_p2 = pnand %p239_p1, %p236_p0 }
   0x9   :  { %244 = shalt.err (!%p241_p2)
}
   0xa   :  { %s245_s20 = scalar_lea.vmem %s17_s10, 128  ;;  %p250_p4 = scmp.lt.s32.totalorder %s17_s10, %s17_s10 }
   0xb   :  { %p246_p3 = scmp.ne.s32.totalorder %s17_s10, %s245_s20  ;;  %p251_p5 = scmp.lt.s32.totalorder %s245_s20, %s245_s20 }
   0xd   :  { %p252_p6 = por %p251_p5, %p250_p4 }
   0xf   :  { %p253_p7 = pnand %p252_p6, %p246_p3 }
  0x11   :  { %256 = shalt.err (!%p253_p7)
}
  0x12   :  { %19 = dma.hbm_to_vmem [thread:$0]  %s373_s0, 128, %s17_s10, [#allocation3]  }
  0x13   :  { %s257_s25 = scalar_lea.hbm %s374_s1, 2048 }
  0x14   :  { %p258_p8 = scmp.ne.s32.totalorder %s374_s1, %s257_s25  ;;  %p261_p9 = scmp.lt.u32.totalorder %s257_s25, %s374_s1 }
  0x16   :  { %p263_p10 = pnand %p261_p9, %p258_p8 }
  0x18   :  { %266 = shalt.err (!%p263_p10)
}
  0x19   :  { %s267_s30 = scalar_lea.vmem %s330_s12, 2048  ;;  %p272_p12 = scmp.lt.s32.totalorder %s330_s12, %s330_s12 }
  0x1a   :  { %p268_p11 = scmp.ne.s32.totalorder %s330_s12, %s267_s30  ;;  %p273_p13 = scmp.lt.s32.totalorder %s267_s30, %s267_s30 }
  0x1c   :  { %p274_p0 = por %p273_p13, %p272_p12 }
  0x1e   :  { %p275_p1 = pnand %p274_p0, %p268_p11 }
  0x20   :  { %278 = shalt.err (!%p275_p1)
}
  0x21   :  { %s309_s0 = smov 128   ;;  %s310_s3 = smov 8  }
  0x22   :  { %31 = dma.hbm_to_vmem [thread:$0]  %s374_s1, 2048, %s330_s12, [#allocation6], %s309_s0, %s309_s0, %s310_s3  }
  0x23   :  { %301 = dma.done.wait [#allocation3], 128  }
  0x24   :  { %302 = vsyncadd [#allocation3], 4294967168 }
  0x25   :  { %303 = dma.done.wait [#allocation6], 2048  }
  0x26   :  { %304 = vsyncadd [#allocation6], 4294965248  ;;  %v311_v0 = vmov 0.0|0.0   ;;  %vm312_vm0 = vmmov 0   ;;  %v313_v1 = vmov 0.0   ;;  %v46_v2 = vld [vmem:[#allocation5] sm:$0xff] }
  0x27   :  { %203 = vmatprep.subr.bf16.mxu0 %v311_v0  ;;  %200 = vmatprep.mubr.msk.f32.mxu0 %vm312_vm0, %v313_v1  ;;  %v47_v3 = vld [vmem:[#allocation5 + $0x8] sm:$0xff]  ;;  %v48_v4 = vld [vmem:[#allocation5 + $0x10] sm:$0xff]  ;;  %v49_v6 = vld [vmem:[#allocation5 + $0x18] sm:$0xff]  ;;  %s314_s1 = smov [#allocation7]  }
  0x28   :  { %v204_v5 = vpack.c.bf16 %v47_v3, %v46_v2  ;;  %v207_v7 = vpack.c.bf16 %v49_v6, %v48_v4  ;;  %v50_v8 = vld [vmem:[#allocation5 + $0x20] sm:$0xff]  ;;  %v51_v9 = vld [vmem:[#allocation5 + $0x28] sm:$0xff]  ;;  %v52_v11 = vld [vmem:[#allocation5 + $0x30] sm:$0xff]  ;;  %s141_s6 = sshll.u32 %s314_s1, 4  ;;  %s142_s6 = int_to_ptr.vmem [resolvable:$true] %s141_s6 }
  0x29   :  { %v210_v10 = vpack.c.bf16 %v51_v9, %v50_v8  ;;  %v53_v12 = vld [vmem:[#allocation5 + $0x38] sm:$0xff]  ;;  %v54_v14 = vld [vmem:[#allocation5 + $0x40] sm:$0xff]  ;;  %v55_v15 = vld [vmem:[#allocation5 + $0x48] sm:$0xff]  ;;  %s279_s7 = scalar_lea.vmem %s142_s6, 128  ;;  %p284_p3 = scmp.lt.s32.totalorder %s142_s6, %s142_s6 }
  0x2a   :  { %205 = vmatpush3.bf16.msra.mxu0 %v204_v5  ;;  %v213_v13 = vpack.c.bf16 %v53_v12, %v52_v11  ;;  %v216_v16 = vpack.c.bf16 %v55_v15, %v54_v14  ;;  %v56_v17 = vld [vmem:[#allocation5 + $0x50] sm:$0xff]  ;;  %v57_v18 = vld [vmem:[#allocation5 + $0x58] sm:$0xff]  ;;  %v58_v20 = vld [vmem:[#allocation5 + $0x60] sm:$0xff]  ;;  %p280_p2 = scmp.ne.s32.totalorder %s142_s6, %s279_s7  ;;  %p285_p4 = scmp.lt.s32.totalorder %s279_s7, %s279_s7 }
  0x2b   :  { %206 = vmatprep.subr.bf16.mxu0 %v311_v0  ;;  %v219_v19 = vpack.c.bf16 %v57_v18, %v56_v17  ;;  %v59_v21 = vld [vmem:[#allocation5 + $0x68] sm:$0xff]  ;;  %v60_v23 = vld [vmem:[#allocation5 + $0x70] sm:$0xff]  ;;  %v61_v24 = vld [vmem:[#allocation5 + $0x78] sm:$0xff] }
  0x2c   :  { %v222_v22 = vpack.c.bf16 %v59_v21, %v58_v20  ;;  %v225_v25 = vpack.c.bf16 %v61_v24, %v60_v23  ;;  %v43_v26 = vld [vmem:[#allocation2] sm:$0xff]  ;;  %p286_p5 = por %p285_p4, %p284_p3 }
  0x2e   :  { %208 = vmatpush3.bf16.msra.mxu0 %v207_v7  ;;  %p287_p6 = pnand %p286_p5, %p280_p2 }
  0x2f   :  { %209 = vmatprep.subr.bf16.mxu0 %v311_v0 }
  0x32   :  { %211 = vmatpush3.bf16.msra.mxu0 %v210_v10 }
  0x33   :  { %212 = vmatprep.subr.bf16.mxu0 %v311_v0 }
  0x36   :  { %214 = vmatpush3.bf16.msra.mxu0 %v213_v13 }
  0x37   :  { %215 = vmatprep.subr.bf16.mxu0 %v311_v0 }
  0x3a   :  { %217 = vmatpush3.bf16.msra.mxu0 %v216_v16 }
  0x3b   :  { %218 = vmatprep.subr.bf16.mxu0 %v311_v0 }
  0x3e   :  { %220 = vmatpush3.bf16.msra.mxu0 %v219_v19 }
  0x3f   :  { %221 = vmatprep.subr.bf16.mxu0 %v311_v0 }
  0x42   :  { %223 = vmatpush3.bf16.msra.mxu0 %v222_v22 }
  0x43   :  { %224 = vmatprep.subr.bf16.mxu0 %v311_v0 }
  0x46   :  { %226 = vmatpush3.bf16.msra.mxu0 %v225_v25 }
  0x49   :  { %201 = vmatmul.mubr.f32.vlgmr.msra.gmra.mrb[0].mxu0 %v43_v26 }
 0x11c   :  { %v129_v27 = vpop.f32.mrb[0].mxu0 }
 0x11d   :  { %v202_v28 = vpop.f32.mrb[1].mxu0  ;;  %134 = vst [vmem:[#allocation7] sm:$0xff] %v129_v27 }
 0x11e   :  { %290 = shalt.err (!%p287_p6)
}
 0x11f   :  { %s291_s10 = scalar_lea.hbm %s375_s2, 128 }
 0x120   :  { %p292_p7 = scmp.ne.s32.totalorder %s375_s2, %s291_s10  ;;  %p295_p8 = scmp.lt.u32.totalorder %s291_s10, %s375_s2 }
 0x122   :  { %p297_p9 = pnand %p295_p8, %p292_p7 }
 0x124   :  { %300 = shalt.err (!%p297_p9)
}
 0x125   :  { %144 = dma.vmem_to_hbm [thread:$0]  %s142_s6, 128, %s375_s2, [#allocation4]  }
 0x126   :  { %305 = dma.done.wait [#allocation4], 128  }
 0x127   :  { %306 = vsyncadd [#allocation4], 4294967168 }
 0x128   :  { %148 = vsyncpa [#allocation3], 1 }
 0x129   :  { %149 = vsyncpa [#allocation6], 1 }
 0x12a   :  { %150 = vsyncpa [#allocation4], 1 }

</bundles_post_ra>
